<compile_context>
chip_gen: v6e
topology: v6e:2x2x1
jax: 0.10.0
libtpu: 0.0.40
codegen_flags: <defaults>
</compile_context>

<pallas_src>
import functools
import math

import jax
import jax.numpy as jnp
from jax import lax
from jax.experimental import pallas as pl
from jax.experimental.pallas import tpu as pltpu


def _apply_activation(y, activation, neg_slope):
    if activation == "leaky_relu":
        return jnp.where(y >= 0, y, neg_slope * y)
    if activation == "relu":
        return jnp.maximum(y, 0.0)
    if activation == "elu":
        return jnp.where(y > 0, y, jnp.expm1(y))
    if activation == "sigmoid":
        return jax.nn.sigmoid(y)
    if activation in ("linear", None):
        return y
    raise ValueError(f"Unsupported activation function: {activation}")


def _conv2d_act_kernel(x_hbm, w_ref, o_ref, xz_ref, sem_ref, *,
                       H, total_rows, block_h, pad, k, chunk_h, tap_concat,
                       activation, neg_slope, compute_dtype, matmul_precision):
    # x_hbm  : (N*H, W*Cin)            full input, left in HBM (pl.ANY)
    # w_ref  : (K, W*Cin, W*Cout) or (K*W*Cin, W*Cout)  banded weight, resident
    # o_ref  : (block_h, W*Cout)       output row-tile (auto-pipelined)
    # xz_ref : (block_h + 16, W*Cin)   window scratch, tile rows at [8, 8+bh)
    # sem_ref: (3,) DMA semaphores     (main window, top halo, bottom halo)
    n = pl.program_id(0)
    i = pl.program_id(1)
    last = pl.num_programs(1) - 1

    # Flat (N*H)-row index of the first row of this tile.
    row0 = pl.multiple_of(n * H + i * block_h, 8)

    def copy_main():
        return pltpu.make_async_copy(x_hbm.at[pl.ds(row0, block_h)],
                                     xz_ref.at[pl.ds(8, block_h)],
                                     sem_ref.at[0])

    def copy_top():
        src = jnp.maximum(row0 - pad, 0)             # only started when i > 0
        return pltpu.make_async_copy(x_hbm.at[pl.ds(src, pad)],
                                     xz_ref.at[pl.ds(8 - pad, pad)],
                                     sem_ref.at[1])

    def copy_bot():
        src = jnp.minimum(row0 + block_h, total_rows - pad)   # only when i < last
        return pltpu.make_async_copy(x_hbm.at[pl.ds(src, pad)],
                                     xz_ref.at[pl.ds(8 + block_h, pad)],
                                     sem_ref.at[2])

    # ---- issue this step's input DMAs: one window + existing halos ----
    copy_main().start()

    @pl.when(i > 0)
    def _():
        copy_top().start()

    @pl.when(i < last)
    def _():
        copy_bot().start()

    # ---- image-boundary padding rows are zeros (disjoint from DMA dsts) ----
    @pl.when(i == 0)
    def _():
        xz_ref[8 - pad:8, :] = jnp.zeros((pad, xz_ref.shape[1]), xz_ref.dtype)

    @pl.when(i == last)
    def _():
        xz_ref[8 + block_h:8 + block_h + pad, :] = jnp.zeros(
            (pad, xz_ref.shape[1]), xz_ref.dtype)

    # ---- wait for this step's data ----
    copy_main().wait()

    @pl.when(i > 0)
    def _():
        copy_top().wait()

    @pl.when(i < last)
    def _():
        copy_bot().wait()

    # ---- row-chunked compute: f32 accumulator stays vreg-resident ----
    for c in range(0, block_h, chunk_h):
        base = 8 - pad + c
        if tap_concat:
            # One MXU matmul of contraction depth K*W*Cin (fills 256-deep MXU).
            xs = jnp.concatenate(
                [xz_ref[base + kh:base + kh + chunk_h, :] for kh in range(k)],
                axis=-1).astype(compute_dtype)
            acc = jnp.dot(xs, w_ref[...], preferred_element_type=jnp.float32,
                          precision=matmul_precision)
        else:
            acc = jnp.zeros((chunk_h, o_ref.shape[1]), jnp.float32)
            for kh in range(k):
                xs = xz_ref[base + kh:base + kh + chunk_h, :].astype(compute_dtype)
                acc = acc + jnp.dot(xs, w_ref[kh],
                                    preferred_element_type=jnp.float32,
                                    precision=matmul_precision)
        o_ref[c:c + chunk_h, :] = _apply_activation(
            acc, activation, neg_slope).astype(o_ref.dtype)


def _round_up(x, m):
    return (x + m - 1) // m * m


def _default_vmem_limit_bytes():
    try:
        cap = int(pltpu.get_tpu_info().vmem_capacity_bytes)
    except Exception:
        cap = 64 * 1024 * 1024   # conservative fallback, fits all generations
    # ~65% of physical VMEM: ~83 MiB on 128 MiB parts (v5e/v6e), ~41 MiB on
    # the 64 MiB v7x, leaving headroom for Mosaic-internal scratch.
    return int(cap * 0.65)


def _pick_block_h(H, wcin_p, wcout_p, itemsize, budget_bytes, max_block_h):
    """Largest multiple of 8 dividing H whose working set fits the budget."""
    best = 8
    th = 8
    limit = min(H, max_block_h, 1024)
    while th <= limit:
        if H % th == 0:
            need = ((th + 16) * wcin_p * itemsize      # manual-DMA input window
                    + 2 * th * wcout_p * itemsize)     # double-buffered out blocks
            if need <= budget_bytes:
                best = th
        th += 8
    return best


def _pick_chunk_h(block_h, wcout_p, acc_budget_bytes=64 * 1024):
    """Largest multiple of 8 dividing block_h with acc <= ~16 vregs."""
    cap = max(8, (acc_budget_bytes // (wcout_p * 4)) // 8 * 8)
    ch = min(block_h, cap)
    while block_h % ch:
        ch -= 8
    return max(ch, 8)


def conv2d_act_nhwc(x_nhwc, weight_oihw, *, activation="leaky_relu",
                    neg_slope=0.1, compute_dtype=jnp.bfloat16,
                    matmul_precision=None, block_h=None, vmem_limit_bytes=None):
    """Conv2d(stride=1, padding=K//2, bias=False) + activation, NHWC in/out.

    Prefer this entry point when chaining layers: the NCHW wrapper below adds
    two full HBM transpose passes around a memory-bound kernel.
    """
    N, H, W, Cin = x_nhwc.shape
    Cout, Cin_w, K, K2 = weight_oihw.shape
    assert Cin_w == Cin and K2 == K
    assert K % 2 == 1, "only odd kernel_size (PyTorch 'same' padding, stride 1)"
    pad = K // 2
    assert pad <= 8, "window scratch covers at most 8 halo rows (K <= 17)"
    assert H % 8 == 0, "H must be a multiple of 8 for this TPU kernel"

    wcin, wcout = W * Cin, W * Cout
    wsize = jnp.dtype(compute_dtype).itemsize
    xsize = jnp.dtype(x_nhwc.dtype).itemsize
    wcin_p = _round_up(wcin, 128)
    wcout_p = _round_up(wcout, 128)

    if vmem_limit_bytes is None:
        vmem_limit_bytes = _default_vmem_limit_bytes()

    # Resident banded weight footprint (2 pipeline buffers, padded layout).
    weight_vmem = 2 * K * _round_up(wcin, 8) * wcout_p * wsize
    budget = vmem_limit_bytes - weight_vmem - (4 << 20)   # Mosaic-internal margin
    min_need = (8 + 16) * wcin_p * xsize + 2 * 8 * wcout_p * xsize
    assert budget >= min_need, (
        "banded weight too large to keep resident in VMEM; use a W-tiled / "
        "im2col variant for this shape")

    # v7x megacore: guarantee >= 2 grid points per image even at batch 1.
    max_block_h = H if (N >= 2 or H < 16) else H // 2
    if block_h is None:
        block_h = _pick_block_h(H, wcin_p, wcout_p, xsize, budget, max_block_h)
    assert block_h % 8 == 0 and H % block_h == 0
    num_h = H // block_h
    chunk_h = _pick_chunk_h(block_h, wcout_p)

    # --- Block-banded weight: BigW[kh, wi*Cin+c, wo*Cout+o] =
    #       w[o, c, kh, wi-wo+pad]  if 0 <= wi-wo+pad < K  else 0.
    # Exact gather/select construction, bit-for-bit before the dtype cast.
    w_hwio = jnp.transpose(weight_oihw, (2, 3, 1, 0)).astype(jnp.float32)
    wi = jnp.arange(W)[:, None]
    wo = jnp.arange(W)[None, :]
    kw_idx = wi - wo + pad                                   # (W, W)
    valid = (kw_idx >= 0) & (kw_idx < K)
    kw_safe = jnp.clip(kw_idx, 0, K - 1)
    blocks = w_hwio[:, kw_safe, :, :]                        # (K, W, W, Cin, Cout)
    blocks = jnp.where(valid[None, :, :, None, None], blocks, 0.0)
    bigw = jnp.transpose(blocks, (0, 1, 3, 2, 4)).reshape(K, wcin, wcout)
    bigw = bigw.astype(compute_dtype)

    # Deep-contraction path only when lane concatenation is relayout-free.
    use_tap_concat = (K > 1) and (wcin % 128 == 0)
    if use_tap_concat:
        w_arg = bigw.reshape(K * wcin, wcout)
        w_spec = pl.BlockSpec((K * wcin, wcout), lambda n, i: (0, 0))
    else:
        w_arg = bigw
        w_spec = pl.BlockSpec((K, wcin, wcout), lambda n, i: (0, 0, 0))

    # Free row-major collapse: minormost dim the kernel sees is W*C (lane-dense).
    x2d = x_nhwc.reshape(N * H, wcin)
    total_rows = N * H

    kernel = functools.partial(
        _conv2d_act_kernel, H=H, total_rows=total_rows, block_h=block_h,
        pad=pad, k=K, chunk_h=chunk_h, tap_concat=use_tap_concat,
        activation=activation, neg_slope=neg_slope,
        compute_dtype=compute_dtype, matmul_precision=matmul_precision)

    flops = 2 * N * H * K * wcin * wcout
    bytes_accessed = ((N * H + N * num_h * 2 * pad) * wcin * xsize   # in + halos
                      + N * H * wcout * xsize                        # output
                      + K * wcin * wcout * wsize)                    # weight

    out2d = pl.pallas_call(
        kernel,
        out_shape=jax.ShapeDtypeStruct((total_rows, wcout), x_nhwc.dtype),
        grid_spec=pltpu.PrefetchScalarGridSpec(
            num_scalar_prefetch=0,
            grid=(N, num_h),
            in_specs=[
                # full input stays in HBM; the kernel DMAs its own window
                pl.BlockSpec(memory_space=pl.ANY),
                # banded weight: constant block index -> resident in VMEM
                w_spec,
            ],
            out_specs=pl.BlockSpec((block_h, wcout),
                                   lambda n, i: (n * num_h + i, 0)),
            scratch_shapes=[
                pltpu.VMEM((block_h + 16, wcin), x_nhwc.dtype),
                pltpu.SemaphoreType.DMA((3,)),
            ]),
        compiler_params=pltpu.CompilerParams(
            dimension_semantics=("parallel", "parallel"),
            vmem_limit_bytes=int(vmem_limit_bytes)),
        cost_estimate=pl.CostEstimate(flops=flops, transcendentals=0,
                                      bytes_accessed=bytes_accessed),
    )(x2d, w_arg)

    return out2d.reshape(N, H, W, Cout)


def conv2d_leaky_relu(x_nchw, weight_oihw, **kwargs):
    """Matches net_utils.Conv2d.forward (default config): NCHW in, NCHW out."""
    x_nhwc = jnp.transpose(x_nchw, (0, 2, 3, 1))
    out_nhwc = conv2d_act_nhwc(x_nhwc, weight_oihw, **kwargs)
    return jnp.transpose(out_nhwc, (0, 3, 1, 2))


def _reference(x_nchw, weight_oihw, neg_slope=0.1):
    out = lax.conv_general_dilated(
        x_nchw, weight_oihw, window_strides=(1, 1), padding="SAME",
        dimension_numbers=("NCHW", "OIHW", "NCHW"))
    return jnp.where(out >= 0, out, neg_slope * out)


if __name__ == "__main__":
    key = jax.random.PRNGKey(0)
    kx, kw_ = jax.random.split(key)

    N, Cin, H, W = 2, 4, 16, 16
    Cout, K = 8, 3
    x = jax.random.normal(kx, (N, Cin, H, W), dtype=jnp.float32)
    # PyTorch default Conv2d init: U(-1/sqrt(fan_in), 1/sqrt(fan_in)).
    bound = 1.0 / math.sqrt(Cin * K * K)
    w = jax.random.uniform(kw_, (Cout, Cin, K, K), jnp.float32, -bound, bound)

    ref = _reference(x, w)
    # Both the XLA reference and the Mosaic matmuls run at the TPU default
    # matmul precision (bf16-input passes, f32 accumulation); 5e-3 covers that
    # while still catching real indexing/weight bugs (which err at O(0.1..1)).
    TOL = dict(atol=5e-3, rtol=5e-3)

    # 1) f32 MXU-input path, forced 2 row-tiles -> exercises halo DMAs + whens.
    out_f32 = jax.block_until_ready(
        conv2d_leaky_relu(x, w, compute_dtype=jnp.float32, block_h=8))
    assert out_f32.shape == (N, Cout, H, W)
    assert jnp.allclose(out_f32, ref, **TOL)

    # 2) f32 path, auto tile size (single row-tile per image at N=2).
    out_f32b = jax.block_until_ready(
        conv2d_leaky_relu(x, w, compute_dtype=jnp.float32))
    assert jnp.allclose(out_f32b, ref, **TOL)

    # 3) default fast path: bf16 MXU inputs, f32 accumulation.
    out_bf16 = jax.block_until_ready(conv2d_leaky_relu(x, w))
    ref_bf16 = _reference(x.astype(jnp.bfloat16).astype(jnp.float32),
                          w.astype(jnp.bfloat16).astype(jnp.float32))
    assert jnp.allclose(out_bf16, ref_bf16, **TOL)

    # 4) odd channel counts, W=12, kernel_size=5 (pad=2), batch 1 (H-axis split).
    x2 = jax.random.normal(kx, (1, 3, 16, 12), dtype=jnp.float32)
    w2 = jax.random.uniform(kw_, (5, 3, 5, 5), jnp.float32, -0.2, 0.2)
    out2 = jax.block_until_ready(
        conv2d_leaky_relu(x2, w2, compute_dtype=jnp.float32))
    assert jnp.allclose(out2, _reference(x2, w2), **TOL)

    # 5) W*Cin multiple of 128 -> tap-concatenated deep-matmul (MXU-fill) path.
    x3 = jax.random.normal(kx, (1, 8, 16, 16), dtype=jnp.float32)
    w3 = jax.random.uniform(kw_, (8, 8, 3, 3), jnp.float32, -0.1, 0.1)
    out3 = jax.block_until_ready(
        conv2d_leaky_relu(x3, w3, compute_dtype=jnp.float32))
    assert jnp.allclose(out3, _reference(x3, w3), **TOL)

    print("KERNEL_OK")
</pallas_src>

<mosaic_0001>
module attributes {stable_mosaic.version = 11 : i64} {
  func.func @_conv2d_act_kernel(%arg0: i32, %arg1: i32, %arg2: memref<32x64xf32, #tpu.memory_space<any>>, %arg3: memref<3x64x128xf32, #tpu.memory_space<vmem>>, %arg4: memref<8x128xf32, #tpu.memory_space<vmem>>, %arg5: memref<24x64xf32, #tpu.memory_space<vmem>>, %arg6: memref<3x!tpu.dma_semaphore, #tpu.memory_space<semaphore_mem>>) attributes {dimension_semantics = [#tpu.dimension_semantics<parallel>, #tpu.dimension_semantics<parallel>], iteration_bounds = array<i64: 2, 2>, scalar_prefetch = 0 : i64, scratch_operands = 2 : i64, tpu.core_type = #tpu.core_type<tc>, window_params = [{}, {pipeline_mode = #tpu.pipeline_mode<synchronous>, transform_indices = @transform_1, window_bounds = array<i64: 3, 64, 128>}, {transform_indices = @transform_2, window_bounds = array<i64: 8, 128>}]} {
    %c16_i32 = arith.constant 16 : i32
    %0 = arith.muli %arg0, %c16_i32 : i32
    %c8_i32 = arith.constant 8 : i32
    %1 = arith.muli %arg1, %c8_i32 : i32
    %2 = arith.addi %0, %1 : i32
    %3 = tpu.assume_multiple %2, 8 : i32
    %c0_i32 = arith.constant 0 : i32
    %c0_i32_0 = arith.constant 0 : i32
    %4 = tpu.memref_slice %arg2[%3, %c0_i32_0] : memref<32x64xf32, #tpu.memory_space<any>> -> memref<8x64xf32, #tpu.memory_space<any>>
    %c8_i32_1 = arith.constant 8 : i32
    %c0_i32_2 = arith.constant 0 : i32
    %5 = tpu.memref_slice %arg5[%c8_i32_1, %c0_i32_2] : memref<24x64xf32, #tpu.memory_space<vmem>> -> memref<8x64xf32, #tpu.memory_space<vmem>>
    %6 = tpu.memref_slice %arg6[%c0_i32] : memref<3x!tpu.dma_semaphore, #tpu.memory_space<semaphore_mem>> -> memref<1x!tpu.dma_semaphore, #tpu.memory_space<semaphore_mem>>
    %7 = tpu.memref_squeeze %6 : memref<1x!tpu.dma_semaphore, #tpu.memory_space<semaphore_mem>> -> memref<!tpu.dma_semaphore, #tpu.memory_space<semaphore_mem>>
    tpu.enqueue_dma source(%4 : memref<8x64xf32, #tpu.memory_space<any>>) target(%5 : memref<8x64xf32, #tpu.memory_space<vmem>>) target_semaphore(%7 : memref<!tpu.dma_semaphore, #tpu.memory_space<semaphore_mem>>)
    %c0_i32_3 = arith.constant 0 : i32
    %8 = arith.cmpi sgt, %arg1, %c0_i32_3 : i32
    %9 = arith.extui %8 : i1 to i32
    %c0_i32_4 = arith.constant 0 : i32
    %10 = arith.cmpi ne, %9, %c0_i32_4 : i32
    scf.if %10 {
      %c1_i32_34 = arith.constant 1 : i32
      %52 = arith.subi %3, %c1_i32_34 : i32
      %c0_i32_35 = arith.constant 0 : i32
      %53 = arith.maxsi %52, %c0_i32_35 : i32
      %c1_i32_36 = arith.constant 1 : i32
      %c0_i32_37 = arith.constant 0 : i32
      %54 = tpu.memref_slice %arg2[%53, %c0_i32_37] : memref<32x64xf32, #tpu.memory_space<any>> -> memref<1x64xf32, #tpu.memory_space<any>>
      %c7_i32 = arith.constant 7 : i32
      %c0_i32_38 = arith.constant 0 : i32
      %55 = tpu.memref_slice %arg5[%c7_i32, %c0_i32_38] : memref<24x64xf32, #tpu.memory_space<vmem>> -> memref<1x64xf32, #tpu.memory_space<vmem>>
      %56 = tpu.memref_slice %arg6[%c1_i32_36] : memref<3x!tpu.dma_semaphore, #tpu.memory_space<semaphore_mem>> -> memref<1x!tpu.dma_semaphore, #tpu.memory_space<semaphore_mem>>
      %57 = tpu.memref_squeeze %56 : memref<1x!tpu.dma_semaphore, #tpu.memory_space<semaphore_mem>> -> memref<!tpu.dma_semaphore, #tpu.memory_space<semaphore_mem>>
      tpu.enqueue_dma source(%54 : memref<1x64xf32, #tpu.memory_space<any>>) target(%55 : memref<1x64xf32, #tpu.memory_space<vmem>>) target_semaphore(%57 : memref<!tpu.dma_semaphore, #tpu.memory_space<semaphore_mem>>)
    } else {
    }
    %c1_i32 = arith.constant 1 : i32
    %11 = arith.cmpi slt, %arg1, %c1_i32 : i32
    %12 = arith.extui %11 : i1 to i32
    %c0_i32_5 = arith.constant 0 : i32
    %13 = arith.cmpi ne, %12, %c0_i32_5 : i32
    scf.if %13 {
      %c8_i32_34 = arith.constant 8 : i32
      %52 = arith.addi %3, %c8_i32_34 : i32
      %c31_i32 = arith.constant 31 : i32
      %53 = arith.minsi %52, %c31_i32 : i32
      %c2_i32 = arith.constant 2 : i32
      %c0_i32_35 = arith.constant 0 : i32
      %54 = tpu.memref_slice %arg2[%53, %c0_i32_35] : memref<32x64xf32, #tpu.memory_space<any>> -> memref<1x64xf32, #tpu.memory_space<any>>
      %c16_i32_36 = arith.constant 16 : i32
      %c0_i32_37 = arith.constant 0 : i32
      %55 = tpu.memref_slice %arg5[%c16_i32_36, %c0_i32_37] : memref<24x64xf32, #tpu.memory_space<vmem>> -> memref<1x64xf32, #tpu.memory_space<vmem>>
      %56 = tpu.memref_slice %arg6[%c2_i32] : memref<3x!tpu.dma_semaphore, #tpu.memory_space<semaphore_mem>> -> memref<1x!tpu.dma_semaphore, #tpu.memory_space<semaphore_mem>>
      %57 = tpu.memref_squeeze %56 : memref<1x!tpu.dma_semaphore, #tpu.memory_space<semaphore_mem>> -> memref<!tpu.dma_semaphore, #tpu.memory_space<semaphore_mem>>
      tpu.enqueue_dma source(%54 : memref<1x64xf32, #tpu.memory_space<any>>) target(%55 : memref<1x64xf32, #tpu.memory_space<vmem>>) target_semaphore(%57 : memref<!tpu.dma_semaphore, #tpu.memory_space<semaphore_mem>>)
    } else {
    }
    %c0_i32_6 = arith.constant 0 : i32
    %14 = arith.cmpi eq, %arg1, %c0_i32_6 : i32
    %15 = arith.extui %14 : i1 to i32
    %c0_i32_7 = arith.constant 0 : i32
    %16 = arith.cmpi ne, %15, %c0_i32_7 : i32
    scf.if %16 {
      %cst_34 = arith.constant 0.000000e+00 : f32
      %52 = vector.broadcast %cst_34 : f32 to vector<1x64xf32>
      %c7_35 = arith.constant 7 : index
      %c0_36 = arith.constant 0 : index
      %53 = vector.load %arg5[%c7_35, %c0_36] : memref<24x64xf32, #tpu.memory_space<vmem>>, vector<1x64xf32>
      tpu.vector_store %arg5[%c7_35, %c0_36], %52 {strides = array<i32>} : memref<24x64xf32, #tpu.memory_space<vmem>>, vector<1x64xf32>,
    } else {
    }
    %c1_i32_8 = arith.constant 1 : i32
    %17 = arith.cmpi eq, %arg1, %c1_i32_8 : i32
    %18 = arith.extui %17 : i1 to i32
    %c0_i32_9 = arith.constant 0 : i32
    %19 = arith.cmpi ne, %18, %c0_i32_9 : i32
    scf.if %19 {
      %cst_34 = arith.constant 0.000000e+00 : f32
      %52 = vector.broadcast %cst_34 : f32 to vector<1x64xf32>
      %c16 = arith.constant 16 : index
      %c0_35 = arith.constant 0 : index
      %53 = vector.load %arg5[%c16, %c0_35] : memref<24x64xf32, #tpu.memory_space<vmem>>, vector<1x64xf32>
      tpu.vector_store %arg5[%c16, %c0_35], %52 {strides = array<i32>} : memref<24x64xf32, #tpu.memory_space<vmem>>, vector<1x64xf32>,
    } else {
    }
    %c0_i32_10 = arith.constant 0 : i32
    %c0_i32_11 = arith.constant 0 : i32
    %20 = tpu.memref_slice %arg2[%3, %c0_i32_11] : memref<32x64xf32, #tpu.memory_space<any>> -> memref<8x64xf32, #tpu.memory_space<any>>
    %c8_i32_12 = arith.constant 8 : i32
    %c0_i32_13 = arith.constant 0 : i32
    %21 = tpu.memref_slice %arg5[%c8_i32_12, %c0_i32_13] : memref<24x64xf32, #tpu.memory_space<vmem>> -> memref<8x64xf32, #tpu.memory_space<vmem>>
    %22 = tpu.memref_slice %arg6[%c0_i32_10] : memref<3x!tpu.dma_semaphore, #tpu.memory_space<semaphore_mem>> -> memref<1x!tpu.dma_semaphore, #tpu.memory_space<semaphore_mem>>
    %23 = tpu.memref_squeeze %22 : memref<1x!tpu.dma_semaphore, #tpu.memory_space<semaphore_mem>> -> memref<!tpu.dma_semaphore, #tpu.memory_space<semaphore_mem>>
    tpu.wait_dma2 semaphore(%23 : memref<!tpu.dma_semaphore, #tpu.memory_space<semaphore_mem>>) src(%20 : memref<8x64xf32, #tpu.memory_space<any>>) dst(%21 : memref<8x64xf32, #tpu.memory_space<vmem>>)
    %c0_i32_14 = arith.constant 0 : i32
    %24 = arith.cmpi sgt, %arg1, %c0_i32_14 : i32
    %25 = arith.extui %24 : i1 to i32
    %c0_i32_15 = arith.constant 0 : i32
    %26 = arith.cmpi ne, %25, %c0_i32_15 : i32
    scf.if %26 {
      %c1_i32_34 = arith.constant 1 : i32
      %52 = arith.subi %3, %c1_i32_34 : i32
      %c0_i32_35 = arith.constant 0 : i32
      %53 = arith.maxsi %52, %c0_i32_35 : i32
      %c1_i32_36 = arith.constant 1 : i32
      %c0_i32_37 = arith.constant 0 : i32
      %54 = tpu.memref_slice %arg2[%53, %c0_i32_37] : memref<32x64xf32, #tpu.memory_space<any>> -> memref<1x64xf32, #tpu.memory_space<any>>
      %c7_i32 = arith.constant 7 : i32
      %c0_i32_38 = arith.constant 0 : i32
      %55 = tpu.memref_slice %arg5[%c7_i32, %c0_i32_38] : memref<24x64xf32, #tpu.memory_space<vmem>> -> memref<1x64xf32, #tpu.memory_space<vmem>>
      %56 = tpu.memref_slice %arg6[%c1_i32_36] : memref<3x!tpu.dma_semaphore, #tpu.memory_space<semaphore_mem>> -> memref<1x!tpu.dma_semaphore, #tpu.memory_space<semaphore_mem>>
      %57 = tpu.memref_squeeze %56 : memref<1x!tpu.dma_semaphore, #tpu.memory_space<semaphore_mem>> -> memref<!tpu.dma_semaphore, #tpu.memory_space<semaphore_mem>>
      tpu.wait_dma2 semaphore(%57 : memref<!tpu.dma_semaphore, #tpu.memory_space<semaphore_mem>>) src(%54 : memref<1x64xf32, #tpu.memory_space<any>>) dst(%55 : memref<1x64xf32, #tpu.memory_space<vmem>>)
    } else {
    }
    %c1_i32_16 = arith.constant 1 : i32
    %27 = arith.cmpi slt, %arg1, %c1_i32_16 : i32
    %28 = arith.extui %27 : i1 to i32
    %c0_i32_17 = arith.constant 0 : i32
    %29 = arith.cmpi ne, %28, %c0_i32_17 : i32
    scf.if %29 {
      %c8_i32_34 = arith.constant 8 : i32
      %52 = arith.addi %3, %c8_i32_34 : i32
      %c31_i32 = arith.constant 31 : i32
      %53 = arith.minsi %52, %c31_i32 : i32
      %c2_i32 = arith.constant 2 : i32
      %c0_i32_35 = arith.constant 0 : i32
      %54 = tpu.memref_slice %arg2[%53, %c0_i32_35] : memref<32x64xf32, #tpu.memory_space<any>> -> memref<1x64xf32, #tpu.memory_space<any>>
      %c16_i32_36 = arith.constant 16 : i32
      %c0_i32_37 = arith.constant 0 : i32
      %55 = tpu.memref_slice %arg5[%c16_i32_36, %c0_i32_37] : memref<24x64xf32, #tpu.memory_space<vmem>> -> memref<1x64xf32, #tpu.memory_space<vmem>>
      %56 = tpu.memref_slice %arg6[%c2_i32] : memref<3x!tpu.dma_semaphore, #tpu.memory_space<semaphore_mem>> -> memref<1x!tpu.dma_semaphore, #tpu.memory_space<semaphore_mem>>
      %57 = tpu.memref_squeeze %56 : memref<1x!tpu.dma_semaphore, #tpu.memory_space<semaphore_mem>> -> memref<!tpu.dma_semaphore, #tpu.memory_space<semaphore_mem>>
      tpu.wait_dma2 semaphore(%57 : memref<!tpu.dma_semaphore, #tpu.memory_space<semaphore_mem>>) src(%54 : memref<1x64xf32, #tpu.memory_space<any>>) dst(%55 : memref<1x64xf32, #tpu.memory_space<vmem>>)
    } else {
    }
    %cst = arith.constant 0.000000e+00 : f32
    %30 = vector.broadcast %cst : f32 to vector<8x128xf32>
    %c7 = arith.constant 7 : index
    %c0 = arith.constant 0 : index
    %31 = vector.load %arg5[%c7, %c0] : memref<24x64xf32, #tpu.memory_space<vmem>>, vector<8x64xf32>
    %c0_18 = arith.constant 0 : index
    %c0_19 = arith.constant 0 : index
    %c0_20 = arith.constant 0 : index
    %32 = vector.load %arg3[%c0_18, %c0_19, %c0_20] : memref<3x64x128xf32, #tpu.memory_space<vmem>>, vector<1x64x128xf32>
    %33 = vector.shape_cast %32 : vector<1x64x128xf32> to vector<64x128xf32>
    %cst_21 = arith.constant dense<0.000000e+00> : vector<8x128xf32>
    %34 = tpu.matmul %31, %33, %cst_21 {dimension_numbers = #tpu.dot_dimension_numbers<[1], [0], [0], [1], [0, 0, 1, 1], [], []>} : vector<8x64xf32>, vector<64x128xf32>, vector<8x128xf32> -> vector<8x128xf32>
    %35 = arith.addf %30, %34 : vector<8x128xf32>
    %c8 = arith.constant 8 : index
    %c0_22 = arith.constant 0 : index
    %36 = vector.load %arg5[%c8, %c0_22] : memref<24x64xf32, #tpu.memory_space<vmem>>, vector<8x64xf32>
    %c1 = arith.constant 1 : index
    %c0_23 = arith.constant 0 : index
    %c0_24 = arith.constant 0 : index
    %37 = vector.load %arg3[%c1, %c0_23, %c0_24] : memref<3x64x128xf32, #tpu.memory_space<vmem>>, vector<1x64x128xf32>
    %38 = vector.shape_cast %37 : vector<1x64x128xf32> to vector<64x128xf32>
    %cst_25 = arith.constant dense<0.000000e+00> : vector<8x128xf32>
    %39 = tpu.matmul %36, %38, %cst_25 {dimension_numbers = #tpu.dot_dimension_numbers<[1], [0], [0], [1], [0, 0, 1, 1], [], []>} : vector<8x64xf32>, vector<64x128xf32>, vector<8x128xf32> -> vector<8x128xf32>
    %40 = arith.addf %35, %39 : vector<8x128xf32>
    %c9 = arith.constant 9 : index
    %c0_26 = arith.constant 0 : index
    %41 = vector.load %arg5[%c9, %c0_26] : memref<24x64xf32, #tpu.memory_space<vmem>>, vector<8x64xf32>
    %c2 = arith.constant 2 : index
    %c0_27 = arith.constant 0 : index
    %c0_28 = arith.constant 0 : index
    %42 = vector.load %arg3[%c2, %c0_27, %c0_28] : memref<3x64x128xf32, #tpu.memory_space<vmem>>, vector<1x64x128xf32>
    %43 = vector.shape_cast %42 : vector<1x64x128xf32> to vector<64x128xf32>
    %cst_29 = arith.constant dense<0.000000e+00> : vector<8x128xf32>
    %44 = tpu.matmul %41, %43, %cst_29 {dimension_numbers = #tpu.dot_dimension_numbers<[1], [0], [0], [1], [0, 0, 1, 1], [], []>} : vector<8x64xf32>, vector<64x128xf32>, vector<8x128xf32> -> vector<8x128xf32>
    %45 = arith.addf %40, %44 : vector<8x128xf32>
    %cst_30 = arith.constant 0.000000e+00 : f32
    %46 = vector.broadcast %cst_30 : f32 to vector<8x128xf32>
    %47 = arith.cmpf oge, %45, %46 : vector<8x128xf32>
    %cst_31 = arith.constant 1.000000e-01 : f32
    %48 = vector.broadcast %cst_31 : f32 to vector<8x128xf32>
    %49 = arith.mulf %48, %45 : vector<8x128xf32>
    %50 = arith.select %47, %45, %49 : vector<8x128xi1>, vector<8x128xf32>
    %c0_32 = arith.constant 0 : index
    %c0_33 = arith.constant 0 : index
    %51 = vector.load %arg4[%c0_32, %c0_33] : memref<8x128xf32, #tpu.memory_space<vmem>>, vector<8x128xf32>
    tpu.vector_store %arg4[%c0_32, %c0_33], %50 {strides = array<i32>} : memref<8x128xf32, #tpu.memory_space<vmem>>, vector<8x128xf32>,
    return
  }
  func.func @transform_1(%arg0: i32, %arg1: i32) -> (i32, i32, i32) {
    %c0_i32 = arith.constant 0 : i32
    %c0_i32_0 = arith.constant 0 : i32
    %c0_i32_1 = arith.constant 0 : i32
    %c0_i32_2 = arith.constant 0 : i32
    return %c0_i32, %c0_i32_0, %c0_i32_1 : i32, i32, i32
  }
  func.func @transform_2(%arg0: i32, %arg1: i32) -> (i32, i32) {
    %c2_i32 = arith.constant 2 : i32
    %0 = arith.muli %arg0, %c2_i32 : i32
    %1 = arith.addi %0, %arg1 : i32
    %c0_i32 = arith.constant 0 : i32
    %c0_i32_0 = arith.constant 0 : i32
    return %1, %c0_i32 : i32, i32
  }
}

</mosaic_0001>

<bundles_post_ra>
// kernel: tpu_custom_call.1
= control target key start
LH: loop header
LB: loop body
LE: loop exit
PB: predicated region body
PF: predicated region fallthrough
CT: control target
= control target key end

     0   :  { %s1318_s0 = inlined_call_operand.hbm [shape: f32[32,64], index: 0, kind: input, shape index: {}]   ;;  %s1319_s1 = inlined_call_operand.hbm [shape: f32[3,64,128], index: 1, kind: input, shape index: {}]   ;;  %s1320_s2 = inlined_call_operand.hbm [shape: f32[32,128], index: 2, kind: output, shape index: {}]  }
   0x1   :  { %1327 = sst [smem:[#allocation23_spill]] %s1319_s1 }
   0x2   :  { %7 = vsyncpa [#allocation5], 0 }
   0x3   :  { %8 = vsyncpa [#allocation6], 0 }
   0x4   :  { %10 = vsyncpa [#allocation6 + $0x1], 0  ;;  %s1044_s9 = smov 0   ;;  %s1046_s10 = smov 0  }
   0x5   :  { %s1048_s11 = smov 0   ;;  %s1050_s12 = smov 0  }
   0x6   :  { %s1052_s13 = smov 0   ;;  %s1054_s14 = smov 0  }
   0x7   :  { %s1056_s15 = smov 0   ;;  %s1058_s16 = smov 0  }
   0x8 LB: > { %s590_s17 = sadd.s32 4294967295, %s1015_s16   ;;  %s591_s18 = sadd.s32 4294967294, %s1015_s16   ;;  %s1015_s16 = sphi %s1058_s16, %s16_s16   ;;  %s1011_s15 = sphi %s1056_s15, %s1356_s15   ;;  %s1007_s14 = sphi %s1054_s14, %s1355_s14   ;;  %s1003_s13 = sphi %s1052_s13, %s1354_s13   ;;  %s999_s12 = sphi %s1050_s12, %s1353_s12   ;;  %s995_s11 = sphi %s1048_s11, %s1352_s11   ;;  %s991_s10 = sphi %s1046_s10, %s1351_s10   ;;  %s987_s9 = sphi %s1044_s9, %s1350_s9  }
   0x9   : > { %s25_s19 = sadd.s32 1, %s1007_s14  ;;  %s28_s20 = sadd.s32 1, %s1011_s15 }
   0xa   : > { %p26_p0 = scmp.ge.s32.totalorder %s25_s19, 2  ;;  %s592_s21 = sshll.u32 %s1011_s15, 1 }
   0xb   : > { %s54_s22 = sadd.s32 %s1007_s14, %s592_s21  ;;  %s60_s23 = sadd.s32 1, %s995_s11 }
   0xc   : > { %s1358_s19 = smov (%p26_p0, %s25_s19), 0  ;;  %s1360_s20 = smov (!%p26_p0, %s28_s20), %s1011_s15 }
   0xd   : > { %1328 = sst [smem:[#allocation21_spill]] %s1358_s19  ;;  %p70_p1 = scmp.ne.s32.totalorder %s995_s11, %s991_s10 }
   0xe   : > { %p71_p2 = scmp.eq.s32.totalorder %s590_s17, 3  ;;  %p30_p3 = scmp.ge.s32.totalorder %s1360_s20, 2 }
   0xf   : > { %p76_p4 = scmp.ne.s32.totalorder %s991_s10, %s987_s9  ;;  %p77_p6 = scmp.eq.s32.totalorder %s591_s18, 3 }
  0x10   : > { %p1098_p5 = por %p71_p2, %p70_p1  ;;  %s1362_s20 = smov (%p30_p3, %s1360_s20), 0 }
  0x11   : > { %1330 = sst [smem:[#allocation22_spill]] %s1362_s20  ;;  %p1104_p7 = por %p77_p6, %p76_p4 }
  0x12   : > { %s1329_s24 = scalar_select %p1098_p5, 1, 0 }
  0x13   : > { %s1331_s25 = scalar_select %p1104_p7, 1, 0 }
  0x14   : > { %p594_p8 = scmp.ge.s32.totalorder %s1015_s16, 1  ;;  %s593_s26 = sshll.u32 %s1362_s20, 1 }
  0x15   : > { %p84_p9 = scmp.lt.s32.totalorder %s1015_s16, 5  ;;  %s56_s27 = sadd.s32 %s593_s26, %s1358_s19 }
  0x16   : > { %s57_s28 = ssub.s32 %s54_s22, %s56_s27  ;;  %p1116_p12 = scmp.eq.s32.totalorder %s590_s17, 0 }
  0x17   : > { %p1112_p10 = pnand %p594_p8, %p84_p9  ;;  %p58_p11 = scmp.eq.s32.totalorder %s57_s28, 0 }
  0x18   : > { %s1017_s4 = smov [#allocation4]  }
  0x19   : > { %p720_p13 = pneg %p1112_p10  ;;  %s96_s5 = sshll.u32 %s1017_s4, 4  ;;  %s97_s5 = int_to_ptr.vmem [resolvable:$true] %s96_s5 }
  0x1a   : > { %s1123_s3 = scalar_select %p58_p11, %s995_s11, %s60_s23  }
  0x1b   : > { %p1127_p0 = pnand %p1116_p12, %p720_p13  ;;  %s820_s7 = scalar_lea.vmem %s97_s5, 3072 }
  0x1c   : > { %p821_p2 = scmp.ne.s32.totalorder %s97_s5, %s820_s7  ;;  %p828_p6 = scmp.lt.s32.totalorder %s97_s5, %s97_s5 }
  0x1d   : > { %p811_p1 = pneg %p1127_p0  ;;  %p829_p8 = scmp.lt.s32.totalorder %s820_s7, %s820_s7 }
  0x1f   : > { %p823_p3 = pnand %p821_p2, %p811_p1  ;;  %p830_p9 = por %p829_p8, %p828_p6 }
  0x21   : > { %p824_p4 = pneg %p823_p3 }
  0x23   : > { %p831_p11 = pnand %p830_p9, %p824_p4 }
  0x25   : > { %834 = shalt.err (!%p831_p11)
}
  0x26   : > { %s1018_s8 = smov 128   ;;  %s1019_s17 = smov 8  }
  0x27   : > { %s1335_s1 = sld [smem:[#allocation23_spill]] }
  0x29   : > { %112 = sbr.rel (%p1112_p10) target bundleno = 393 (0x189), region = 24 }
  0x2d   : > { %723 = dma.hbm_to_vmem [thread:$0]  (!%p1127_p0), %s1335_s1, 3072, %s97_s5, [#allocation5], %s1018_s8, %s1018_s8, %s1019_s17  }
  0x2e   : > { %968 = dma.done.wait (%p1116_p12), [#allocation5], 3072  }
  0x2f   : > { %970 = vsyncadd (%p1116_p12), [#allocation5], 4294964224  ;;  %s1321_s22 = sand.u32 1, %s991_s10   ;;  %s599_s23 = sshll.u32 %s1003_s13, 4 }
  0x30   : > { %s1148_s26 = sshll.u32 %s1321_s22, 3  ;;  %s600_s27 = sshll.u32 %s999_s12, 3 }
  0x31   : > { %s1151_s28 = sadd.s32 %s600_s27, %s599_s23  ;;  %s1020_s6 = smov [#allocation2 + $0x8]  }
  0x32   : > { %s601_s29 = sshll.u32 %s1151_s28, 4  ;;  %s142_s7 = sshll.u32 %s1020_s6, 4  ;;  %s143_s7 = int_to_ptr.vmem [resolvable:$true] %s142_s7 }
  0x33   : > { %s133_s30 = scalar_lea.hbm %s1318_s0, %s601_s29  ;;  %s603_s8 = sadd.s32 4294967295, %s1151_s28 }
  0x34   : > { %s835_s17 = scalar_lea.hbm %s133_s30, 128  ;;  %s1161_s22 = scalar_lea.hbm %s1318_s0, 512 }
  0x35   : > { %p836_p10 = scmp.ne.s32.totalorder %s133_s30, %s835_s17  ;;  %p838_p12 = scmp.lt.s32.totalorder %s133_s30, %s1318_s0 }
  0x36   : > { %p839_p13 = scmp.lt.s32.totalorder %s1161_s22, %s835_s17 }
  0x38   : > { %p840_p0 = por %p839_p13, %p838_p12 }
  0x3a   : > { %p841_p1 = pnand %p840_p0, %p836_p10 }
  0x3c   : > { %844 = shalt.err (!%p841_p1)  }
  0x3d   : > { %s845_s29 = scalar_lea.vmem %s143_s7, 128  ;;  %s1021_s4 = smov [#allocation2]  }
  0x3e   : > { %p846_p2 = scmp.ne.s32.totalorder %s143_s7, %s845_s29  ;;  %s847_s5 = sshll.u32 %s1021_s4, 4  ;;  %s1167_s5 = int_to_ptr.vmem [resolvable:$false] %s847_s5 }
  0x3f   : > { %s1170_s6 = scalar_lea.vmem %s1167_s5, 384  ;;  %p850_p3 = scmp.lt.s32.totalorder %s143_s7, %s1167_s5 }
  0x40   : > { %p851_p4 = scmp.lt.s32.totalorder %s1170_s6, %s845_s29 }
  0x42   : > { %p852_p6 = por %p851_p4, %p850_p3 }
  0x44   : > { %p853_p8 = pnand %p852_p6, %p846_p2 }
  0x46   : > { %856 = shalt.err (!%p853_p8)  }
  0x47   : > { %145 = dma.hbm_to_vmem [thread:$0]  %s133_s30, 128, %s143_s7, [#allocation3] }
  0x48   : > { %p151_p9 = scmp.gt.s32.totalorder %s603_s8, 0  ;;  %s1322_s17 = sadd.s32 8, %s1151_s28 }
  0x49   : > { %p1177_p11 = scmp.lt.s32.totalorder %s1322_s17, 31  ;;  %p1326_p10 = scmp.gt.s32.totalorder %s999_s12, 0 }
  0x4a   : > { %s1364_s8 = smov (!%p151_p9, %s603_s8), 0  ;;  %s1022_s21 = smov [#allocation2 + $0x7]  }
  0x4b   : > { %s164_s23 = sshll.u32 %s1022_s21, 4  ;;  %s604_s27 = sshll.u32 %s1364_s8, 4  ;;  %s165_s23 = int_to_ptr.vmem [resolvable:$true] %s164_s23 }
  0x4c   : > { %s154_s29 = scalar_lea.hbm %s1318_s0, %s604_s27 }
  0x4d   : > { %s857_s4 = scalar_lea.hbm %s154_s29, 16  ;;  %p862_p2 = scmp.lt.s32.totalorder %s154_s29, %s1318_s0 }
  0x4e   : > { %p858_p13 = scmp.ne.s32.totalorder %s154_s29, %s857_s4  ;;  %p863_p3 = scmp.lt.s32.totalorder %s1161_s22, %s857_s4 }
  0x50   : > { %p859_p0 = pnand %p858_p13, %p1326_p10  ;;  %p864_p4 = por %p863_p3, %p862_p2 }
  0x52   : > { %p860_p1 = pneg %p859_p0 }
  0x54   : > { %p865_p6 = pnand %p864_p4, %p860_p1 }
  0x56   : > { %868 = shalt.err (!%p865_p6)  }
  0x57   : > { %s869_s8 = scalar_lea.vmem %s165_s23, 16  ;;  %p876_p7 = scmp.lt.s32.totalorder %s165_s23, %s1167_s5 }
  0x58   : > { %p870_p8 = scmp.ne.s32.totalorder %s165_s23, %s869_s8  ;;  %p877_p5 = scmp.lt.s32.totalorder %s1170_s6, %s869_s8 }
  0x5a   : > { %p871_p9 = pnand %p870_p8, %p1326_p10  ;;  %p878_p13 = por %p877_p5, %p876_p7 }
  0x5c   : > { %p872_p12 = pneg %p871_p9 }
  0x5e   : > { %p879_p0 = pnand %p878_p13, %p872_p12 }
  0x60   : > { %882 = shalt.err (!%p879_p0)  }
  0x61   : > { %711 = dma.hbm_to_vmem [thread:$0]  (%p1326_p10), %s154_s29, 16, %s165_s23, [#allocation3 + $0x1] }
  0x62   : > { %s1337_s1 = sadd.s32 8, %s1151_s28  ;;  %s1023_s21 = smov [#allocation2 + $0x10]  }
  0x63   : > { %s1366_s1 = smov (!%p1177_p11, %s1337_s1), 31  ;;  %s186_s27 = sshll.u32 %s1023_s21, 4  ;;  %s187_s27 = int_to_ptr.vmem [resolvable:$true] %s186_s27 }
  0x64   : > { %s606_s17 = sshll.u32 %s1366_s1, 4  ;;  %p1338_p7 = scmp.lt.s32.totalorder %s999_s12, 1 }
  0x65   : > { %s176_s4 = scalar_lea.hbm %s1318_s0, %s606_s17 }
  0x66   : > { %s883_s8 = scalar_lea.hbm %s176_s4, 16  ;;  %p888_p2 = scmp.lt.s32.totalorder %s176_s4, %s1318_s0 }
  0x67   : > { %p884_p5 = scmp.ne.s32.totalorder %s176_s4, %s883_s8  ;;  %p889_p3 = scmp.lt.s32.totalorder %s1161_s22, %s883_s8 }
  0x69   : > { %p885_p12 = pnand %p884_p5, %p1338_p7  ;;  %p890_p4 = por %p889_p3, %p888_p2 }
  0x6b   : > { %p886_p1 = pneg %p885_p12 }
  0x6d   : > { %p891_p11 = pnand %p890_p4, %p886_p1 }
  0x6f   : > { %894 = shalt.err (!%p891_p11)  }
  0x70   : > { %s895_s28 = scalar_lea.vmem %s187_s27, 16  ;;  %p1339_p8 = pmov %p1338_p7 }
  0x71   : > { %p896_p6 = scmp.ne.s32.totalorder %s187_s27, %s895_s28  ;;  %p902_p0 = scmp.lt.s32.totalorder %s187_s27, %s1167_s5 }
  0x72   : > { %p903_p10 = scmp.lt.s32.totalorder %s1170_s6, %s895_s28 }
  0x73   : > { %p897_p9 = pnand %p896_p6, %p1339_p8 }
  0x74   : > { %p904_p5 = por %p903_p10, %p902_p0 }
  0x75   : > { %p898_p13 = pneg %p897_p9 }
  0x77   : > { %p905_p7 = pnand %p904_p5, %p898_p13 }
  0x79   : > { %908 = shalt.err (!%p905_p7)  }
  0x7a   : > { %p1340_p12 = pmov %p1339_p8  ;;  %s126_s19 = scalar_lea.vmem [#allocation7], %s1148_s26 }
  0x7b   : > { %p607_p1 = scmp.ne.s32.totalorder %s999_s12, 0 }
  0x7c   : > { %713 = dma.hbm_to_vmem [thread:$0]  (%p1340_p12), %s176_s4, 16, %s187_s27, [#allocation3 + $0x2] }
  0x7d   : > { %193 = sbr.rel (%p607_p1) target bundleno = 132 (0x84), region = 52 }
  0x82   : > { %vm194_vm0 = vcmask 516096   ;;  %v1024_v0 = vmov 0.0  }
  0x83   : > { %195 = vst.msk [vmem:[#allocation2 + $0x7] sm:$0x1] %vm194_vm0, %v1024_v0 }
  0x84 PF: > { %p608_p2 = scmp.ne.s32.totalorder %s999_s12, 1 }
  0x86   : > { %199 = sbr.rel (%p608_p2) target bundleno = 141 (0x8d), region = 56 }
  0x8b   : > { %vm200_vm1 = vcmask 516096   ;;  %v1025_v1 = vmov 0.0  }
  0x8c   : > { %201 = vst.msk [vmem:[#allocation2 + $0x10] sm:$0x1] %vm200_vm1, %v1025_v1 }
  0x8d PF: > { %971 = dma.done.wait [#allocation3], 128 }
  0x8e   : > { %972 = vsyncadd [#allocation3], 4294967168  ;;  %p1341_p10 = scmp.gt.s32.totalorder %s999_s12, 0 }
  0x90   : > { %974 = dma.done.wait (%p1341_p10), [#allocation3 + $0x1], 16  ;;  %p1342_p3 = pmov %p1341_p10 }
  0x91   : > { %p1343_p4 = scmp.lt.s32.totalorder %s999_s12, 1 }
  0x92   : > { %976 = vsyncadd (%p1342_p3), [#allocation3 + $0x1], 4294967280 }
  0x93   : > { %978 = dma.done.wait (%p1343_p4), [#allocation3 + $0x2], 16  ;;  %p1344_p11 = pmov %p1343_p4 }
  0x94   : > { %v1026_v2 = vmov 0.0   ;;  %vm1027_vm2 = vmmov 0   ;;  %v237_v3 = vld [vmem:[#allocation4 + $0x78] sm:$0xff]  ;;  %v236_v5 = vld [vmem:[#allocation4 + $0x70] sm:$0xff]  ;;  %v235_v7 = vld [vmem:[#allocation4 + $0x68] sm:$0xff]  ;;  %vm238_vm3 = vcmask 523264  }
  0x95   : > { %980 = vsyncadd (%p1344_p11), [#allocation3 + $0x2], 4294967280  ;;  %649 = vmatprep.subr.mxu0 %v1026_v2  ;;  %668 = vmatprep.subr.mxu1 %v1026_v2  ;;  %v227_v4 = vld [vmem:[#allocation4 + $0x38] sm:$0xff]  ;;  %v226_v6 = vld [vmem:[#allocation4 + $0x30] sm:$0xff]  ;;  %s615_s20 = sshll.u32 %s1003_s13, 1  ;;  %s489_s6 = sshll.u32 %s126_s19, 4  ;;  %s490_s6 = int_to_ptr.vmem [resolvable:$true] %s489_s6 }
  0x96   : > { %665 = vmatprep.mubr.msk.f32.mxu0 %vm1027_vm2, %v1026_v2  ;;  %684 = vmatprep.mubr.msk.f32.mxu1 %vm1027_vm2, %v1026_v2  ;;  %v225_v8 = vld [vmem:[#allocation4 + $0x28] sm:$0xff]  ;;  %v234_v9 = vld [vmem:[#allocation4 + $0x60] sm:$0xff]  ;;  %v233_v11 = vld [vmem:[#allocation4 + $0x58] sm:$0xff]  ;;  %s482_s22 = sadd.s32 %s999_s12, %s615_s20  ;;  %s1345_s12 = sand.u32 1, %s991_s10  }
  0x97   : > { %650 = vmatpush3.msra.mxu0 %v237_v3  ;;  %669 = vmatpush3.msra.mxu1 %v227_v4  ;;  %v224_v10 = vld [vmem:[#allocation4 + $0x20] sm:$0xff]  ;;  %v223_v12 = vld [vmem:[#allocation4 + $0x18] sm:$0xff]  ;;  %v232_v13 = vld [vmem:[#allocation4 + $0x50] sm:$0xff]  ;;  %s616_s5 = sshll.u32 %s482_s22, 7  ;;  %s474_s13 = scalar_lea.sflag [#allocation6], %s1345_s12 }
  0x98   : > { %651 = vmatprep.subr.mxu0 %v1026_v2  ;;  %670 = vmatprep.subr.mxu1 %v1026_v2  ;;  %v222_v14 = vld [vmem:[#allocation4 + $0x10] sm:$0xff]  ;;  %v231_v15 = vld [vmem:[#allocation4 + $0x48] sm:$0xff]  ;;  %v230_v17 = vld [vmem:[#allocation4 + $0x40] sm:$0xff]  ;;  %s1268_s29 = scalar_lea.hbm %s1320_s2, %s616_s5  ;;  %s909_s1 = scalar_lea.vmem %s490_s6, 128 }
  0x99   : > { %652 = vmatpush3.msra.mxu0 %v236_v5  ;;  %671 = vmatpush3.msra.mxu1 %v226_v6  ;;  %v221_v16 = vld [vmem:[#allocation4 + $0x8] sm:$0xff]  ;;  %v220_v18 = vld [vmem:[#allocation4] sm:$0xff]  ;;  %v228_v19 = vld [vmem:[#allocation2 + $0x8] sm:$0xff]  ;;  %p910_p6 = scmp.ne.s32.totalorder %s490_s6, %s909_s1  ;;  %p1346_p8 = scmp.ne.s32.totalorder %s1329_s24, 0 }
  0x9a   : > { %653 = vmatprep.subr.mxu0 %v1026_v2  ;;  %672 = vmatprep.subr.mxu1 %v1026_v2  ;;  %v219_v20 = vld [vmem:[#allocation2 + $0x7] sm:$0xff]  ;;  %v394_v21 = vld [vmem:[#allocation4 + $0xb8] sm:$0xff]  ;;  %v391_v24 = vld [vmem:[#allocation4 + $0xa0] sm:$0xff]  ;;  %s1028_s17 = smov [#allocation7]  }
  0x9b   : > { %654 = vmatpush3.msra.mxu0 %v235_v7  ;;  %673 = vmatpush3.msra.mxu1 %v225_v8  ;;  %v393_v22 = vld [vmem:[#allocation4 + $0xb0] sm:$0xff]  ;;  %v392_v23 = vld [vmem:[#allocation4 + $0xa8] sm:$0xff]  ;;  %v390_v25 = vld [vmem:[#allocation4 + $0x98] sm:$0xff]  ;;  %p911_p9 = pnand %p910_p6, %p1346_p8  ;;  %s913_s21 = sshll.u32 %s1028_s17, 4  ;;  %s914_s21 = int_to_ptr.vmem [resolvable:$false] %s913_s21 }
  0x9c   : > { %655 = vmatprep.subr.mxu0 %v1026_v2  ;;  %674 = vmatprep.subr.mxu1 %v1026_v2  ;;  %v389_v26 = vld [vmem:[#allocation4 + $0x90] sm:$0xff]  ;;  %v388_v27 = vld [vmem:[#allocation4 + $0x88] sm:$0xff]  ;;  %v387_v28 = vld [vmem:[#allocation4 + $0x80] sm:$0xff]  ;;  %s915_s27 = scalar_lea.vmem %s914_s21, 256  ;;  %p916_p0 = scmp.lt.s32.totalorder %s490_s6, %s914_s21 }
  0x9d   : > { %656 = vmatpush3.msra.mxu0 %v234_v9  ;;  %675 = vmatpush3.msra.mxu1 %v224_v10  ;;  %v385_v29 = vld [vmem:[#allocation2 + $0x9] sm:$0xff]  ;;  %p912_p13 = pneg %p911_p9  ;;  %p917_p5 = scmp.lt.s32.totalorder %s915_s27, %s909_s1 }
  0x9e   : > { %657 = vmatprep.subr.mxu0 %v1026_v2  ;;  %676 = vmatprep.subr.mxu1 %v1026_v2 }
  0x9f   : > { %658 = vmatpush3.msra.mxu0 %v233_v11  ;;  %677 = vmatpush3.msra.mxu1 %v223_v12  ;;  %p918_p7 = por %p917_p5, %p916_p0 }
  0xa0   : > { %659 = vmatprep.subr.mxu0 %v1026_v2  ;;  %678 = vmatprep.subr.mxu1 %v1026_v2 }
  0xa1   : > { %660 = vmatpush3.msra.mxu0 %v232_v13  ;;  %679 = vmatpush3.msra.mxu1 %v222_v14  ;;  %p919_p12 = pnand %p918_p7, %p912_p13 }
  0xa2   : > { %661 = vmatprep.subr.mxu0 %v1026_v2  ;;  %680 = vmatprep.subr.mxu1 %v1026_v2 }
  0xa3   : > { %662 = vmatpush3.msra.mxu0 %v231_v15  ;;  %681 = vmatpush3.msra.mxu1 %v221_v16 }
  0xa4   : > { %663 = vmatprep.subr.mxu0 %v1026_v2  ;;  %682 = vmatprep.subr.mxu1 %v1026_v2 }
  0xa5   : > { %664 = vmatpush3.msra.mxu0 %v230_v17  ;;  %683 = vmatpush3.msra.mxu1 %v220_v18 }
  0xa6   : > { %666 = vmatmul.mubr.msk.f32.vlgmr.msra.gmra.mxu0 %vm238_vm3, %v228_v19  ;;  %687 = vmatprep.subr.mxu0 %v1026_v2 }
  0xa7   : > { %685 = vmatmul.mubr.msk.f32.vlgmr.msra.gmra.mxu1 %vm238_vm3, %v219_v20  ;;  %688 = vmatpush3.msra.mxu0 %v394_v21 }
  0xa8   : > { %689 = vmatprep.subr.mxu0 %v1026_v2  ;;  %703 = vmatprep.mubr.msk.f32.mxu0 %vm1027_vm2, %v1026_v2 }
  0xa9   : > { %690 = vmatpush3.msra.mxu0 %v393_v22 }
  0xaa   : > { %691 = vmatprep.subr.mxu0 %v1026_v2 }
  0xab   : > { %692 = vmatpush3.msra.mxu0 %v392_v23 }
  0xac   : > { %693 = vmatprep.subr.mxu0 %v1026_v2 }
  0xad   : > { %694 = vmatpush3.msra.mxu0 %v391_v24 }
  0xae   : > { %695 = vmatprep.subr.mxu0 %v1026_v2 }
  0xaf   : > { %696 = vmatpush3.msra.mxu0 %v390_v25 }
  0xb0   : > { %697 = vmatprep.subr.mxu0 %v1026_v2 }
  0xb1   : > { %698 = vmatpush3.msra.mxu0 %v389_v26 }
  0xb2   : > { %699 = vmatprep.subr.mxu0 %v1026_v2 }
  0xb3   : > { %700 = vmatpush3.msra.mxu0 %v388_v27 }
  0xb4   : > { %701 = vmatprep.subr.mxu0 %v1026_v2 }
  0xb5   : > { %702 = vmatpush3.msra.mxu0 %v387_v28 }
  0xb6   : > { %704 = vmatmul.mubr.msk.f32.vlgmr.msra.gmra.mxu0 %vm238_vm3, %v385_v29 }
 0x166   : > { %v308_v30 = vpop.f32.mrf.mxu0 }
 0x167   : > { %v381_v31 = vpop.f32.mrf.mxu1 }
 0x168   : > { %v667_v32 = vpop.f32.mrf.mxu0  ;;  %v382_v34 = vadd.f32 %v381_v31, %v308_v30 }
 0x169   : > { %v686_v33 = vpop.f32.mrf.mxu1 }
 0x176   : > { %v464_v35 = vpop.f32.mrf.mxu0 }
 0x177   : > { %v468_v36 = vadd.f32 %v464_v35, %v382_v34 }
 0x178   : > { %v705_v37 = vpop.f32.mrf.mxu0 }
 0x179   : > { %vm469_vm4 = vcmp.ge.f32.partialorder %v468_v36, 0.0  ;;  %v470_v38 = vmul.f32 0.1, %v468_v36 }
 0x17b   : > { %v471_v39 = vsel %vm469_vm4, %v468_v36, %v470_v38 }
 0x17c   : > { %472 = vst [vmem:[%s126_s19] sm:$0xff] %v471_v39 }
 0x17d   : > { %922 = shalt.err (!%p919_p12)
}
 0x17e   : > { %s923_s26 = scalar_lea.hbm %s1268_s29, 128  ;;  %s927_s4 = scalar_lea.hbm %s1320_s2, 512 }
 0x17f   : > { %p924_p1 = scmp.ne.s32.totalorder %s1268_s29, %s923_s26  ;;  %p928_p3 = scmp.lt.s32.totalorder %s1268_s29, %s1320_s2 }
 0x180   : > { %p929_p4 = scmp.lt.s32.totalorder %s927_s4, %s923_s26 }
 0x181   : > { %p925_p2 = pnand %p924_p1, %p1346_p8 }
 0x182   : > { %p930_p11 = por %p929_p4, %p928_p3 }
 0x183   : > { %p926_p10 = pneg %p925_p2 }
 0x185   : > { %p931_p6 = pnand %p930_p11, %p926_p10 }
 0x187   : > { %934 = shalt.err (!%p931_p6)
}
 0x188   : > { %718 = dma.vmem_to_hbm [thread:$0]  (%p1346_p8), %s490_s6, 128, %s1268_s29, %s474_s13  }
 0x189 PF: > { %p734_p9 = scmp.ge.s32.totalorder %s1015_s16, 2  ;;  %s501_s19 = sand.u32 1, %s987_s9  }
 0x18a   : > { %p1347_p13 = scmp.ne.s32.totalorder %s1331_s25, 0  ;;  %s502_s20 = scalar_lea.sflag [#allocation6], %s501_s19 }
 0x18c   : > { %p725_p0 = pnand %p734_p9, %p1347_p13 }
 0x18e   : > { %p726_p5 = pneg %p725_p0 }
 0x190   : > { %982 = dma.done.wait (%p726_p5), %s502_s20, 128  }
 0x191   : > { %984 = vsyncadd (%p726_p5), %s502_s20, 4294967168  ;;  %s16_s16 = sadd.s32 1, %s1015_s16   ;;  %s1348_s24 = sld [smem:[#allocation21_spill]] }
 0x192   : > { %p13_p7 = scmp.ge.s32.totalorder %s16_s16, 6   ;;  %s1349_s22 = sld [smem:[#allocation22_spill]] }
 0x193   : > { %s1350_s9 = smov %s991_s10  ;;  %s1351_s10 = smov %s995_s11 }
 0x194   : > { %s1352_s11 = smov %s1123_s3  ;;  %s1353_s12 = smov %s1007_s14 }
 0x195   : > { %s1354_s13 = smov %s1011_s15  ;;  %15 = sbr.rel (!%p13_p7) target bundleno = 8 (0x8), region = 111 }
 0x197   : > { %s1355_s14 = smov %s1348_s24 }
 0x198   : > { %s1356_s15 = smov %s1349_s22 }
 0x19a   :  { %507 = vsyncpa [#allocation5], 1 }
 0x19b   :  { %509 = vsyncpa [#allocation5 + $0x1], 1 }
 0x19c   :  { %510 = vsyncpa [#allocation6], 1 }
 0x19d   :  { %512 = vsyncpa [#allocation6 + $0x1], 1 }
 0x19e   :  { %513 = vsyncmov [#allocation3] }
 0x1a1   :  { %s514_s25 = vpop.sfrf %513 }
 0x1a2   :  { %p619_p8 = scmp.ne.s32.totalorder %s514_s25, 0 }
 0x1a4   :  { %518 = shalt.err (%p619_p8)  }
 0x1a5   :  { %520 = vsyncmov [#allocation3 + $0x1] }
 0x1a8   :  { %s521_s3 = vpop.sfrf %520 }
 0x1a9   :  { %p620_p12 = scmp.ne.s32.totalorder %s521_s3, 0 }
 0x1ab   :  { %525 = shalt.err (%p620_p12)  }
 0x1ac   :  { %527 = vsyncmov [#allocation3 + $0x2] }
 0x1af   :  { %s528_s5 = vpop.sfrf %527 }
 0x1b0   :  { %p621_p1 = scmp.ne.s32.totalorder %s528_s5, 0 }
 0x1b2   :  { %532 = shalt.err (%p621_p1)  }

</bundles_post_ra>
